<compile_context>
chip_gen: v6e
topology: v6e:2x2x1
jax: 0.10.0
libtpu: 0.0.40
codegen_flags: <defaults>
</compile_context>

<pallas_src>
import jax
import jax.numpy as jnp
from jax.experimental import pallas as pl
from jax.experimental.pallas import tpu as pltpu


def logreg_kernel(item_ref, user_ref, wbd_ref, wub_ref, b_ref, out_ref):
    # item_ref: [tn, I*D] (bf16/f32) lane-dense flattened item embeddings (streamed)
    # user_ref: [tn, D]   (bf16/f32) user embeddings (streamed)
    # wbd_ref:  [I*D, I]  f32        block-diagonal item weight (resident)
    # wub_ref:  [D, I]    f32        user weight broadcast over the I columns (resident)
    # b_ref:    [1]       f32        bias scalar in SMEM
    # out_ref:  [tn, I]   f32
    item_part = jnp.dot(item_ref[...].astype(jnp.float32), wbd_ref[...],
                        preferred_element_type=jnp.float32)          # [tn, I]  (MXU)
    user_part = jnp.dot(user_ref[...].astype(jnp.float32), wub_ref[...],
                        preferred_element_type=jnp.float32)          # [tn, I]  (MXU)
    out_ref[...] = (item_part + user_part + b_ref[0]).astype(out_ref.dtype)


def _round_up(x, m):
    return ((x + m - 1) // m) * m


def _row_tiling(n, tn, target):
    """Pick a row tile (multiple of 8) and a padded row count (multiple of the tile)."""
    if tn is None:
        tn = min(_round_up(n, 8), _round_up(target, 8))
        steps = -(-n // tn)
        if steps > 1 and steps % 2 == 1:   # v7x megacore: prefer an even grid length
            steps += 1
            tn = _round_up(-(-n // steps), 8)
    else:
        assert tn % 8 == 0, "explicit row tile must be a multiple of 8 (sublane)"
    return tn, _round_up(n, tn)


def logistic_regression_forward(item_embs, user_embs, weight_t, bias, *,
                                tn=None, tn_target=4096):
    """item_embs [B,S,I,D], user_embs [B,S,D], weight_t [2D,1], bias [1] -> [B,S,I] f32."""
    B, S, I, D = item_embs.shape
    N = B * S
    assert weight_t.shape == (2 * D, 1), "kernel specializes the Linear(2D -> 1) head"

    tn, n_pad = _row_tiling(N, tn, tn_target)

    # Lane-dense input layouts (contiguous reshapes, no data movement).
    item2 = item_embs.reshape(N, I * D)     # last dim = I*D (multiple of 128 for D=32, I=16)
    user2 = user_embs.reshape(N, D)
    if n_pad != N:                          # ragged N: pad rows instead of rejecting
        item2 = jnp.pad(item2, ((0, n_pad - N), (0, 0)))
        user2 = jnp.pad(user2, ((0, n_pad - N), (0, 0)))

    # Split the linear weight: first D rows act on item embs, last D rows on user embs.
    w_item = weight_t[:D, 0].astype(jnp.float32)                           # [D]
    w_user = weight_t[D:, 0].astype(jnp.float32)                           # [D]
    # Block-diagonal item weight: w_bd[i*D + d, i] = w_item[d]
    w_bd = jnp.kron(jnp.eye(I, dtype=jnp.float32), w_item.reshape(D, 1))   # [I*D, I]
    # User weight broadcast across the I item slots: w_ub[d, i] = w_user[d]
    w_ub = jnp.tile(w_user.reshape(D, 1), (1, I))                          # [D, I]
    b1 = bias.reshape(1).astype(jnp.float32)                               # [1] SMEM scalar

    out = pl.pallas_call(
        logreg_kernel,
        out_shape=jax.ShapeDtypeStruct((n_pad, I), jnp.float32),
        grid=(n_pad // tn,),
        in_specs=[
            pl.BlockSpec((tn, I * D), lambda n: (n, 0)),         # item rows, streamed
            pl.BlockSpec((tn, D), lambda n: (n, 0)),             # user rows, streamed
            pl.BlockSpec((I * D, I), lambda n: (0, 0)),          # resident block-diag weight
            pl.BlockSpec((D, I), lambda n: (0, 0)),              # resident user weight
            pl.BlockSpec(memory_space=pltpu.MemorySpace.SMEM),   # bias scalar in SMEM
        ],
        out_specs=pl.BlockSpec((tn, I), lambda n: (n, 0)),
        compiler_params=pltpu.CompilerParams(
            dimension_semantics=("parallel",),        # megacore-shardable on v7x
            vmem_limit_bytes=32 * 1024 * 1024,        # explicit: portable v5e/v6e/v7x
        ),
    )(item2, user2, w_bd, w_ub, b1)
    return out[:N].reshape(B, S, I)


if __name__ == "__main__":
    # Small deterministic setup: B slates of S positions, I items per position, emb dim D.
    B, S, I, D = 2, 64, 16, 32
    OUT_DIM = 1
    NUM_ITEMS, NUM_USERS = 100, 20

    key = jax.random.PRNGKey(0)
    k_it, k_us, k_w, k_b, k_iid, k_uid = jax.random.split(key, 6)

    # Deterministic "embedding module": lookup tables stored in bf16 at the source so the
    # gathered activations stream at half the HBM bytes (review item; no wrapper astype
    # of the batch-sized activations).
    item_table = jax.random.normal(k_it, (NUM_ITEMS, D), dtype=jnp.float32).astype(jnp.bfloat16)
    user_table = jax.random.normal(k_us, (NUM_USERS, D), dtype=jnp.float32).astype(jnp.bfloat16)

    # Linear(2D -> 1): weight stored transposed ([2D, O]) plus bias [O], both f32.
    weight_t = (jax.random.normal(k_w, (2 * D, OUT_DIM), dtype=jnp.float32)
                * (1.0 / jnp.sqrt(2.0 * D)))
    bias = jax.random.normal(k_b, (OUT_DIM,), dtype=jnp.float32) * 0.01

    # "batch": integer ids for items and users.
    item_ids = jax.random.randint(k_iid, (B, S, I), 0, NUM_ITEMS)
    user_ids = jax.random.randint(k_uid, (B, S), 0, NUM_USERS)

    # Embedding lookups (plain-JAX glue; see TODO(synk) at the top of the file).
    item_embs = item_table[item_ids]   # [B, S, I, D] bf16
    user_embs = user_table[user_ids]   # [B, S, D]    bf16

    # Small explicit tn so the multi-step pipelined grid path (grid=4, even) is exercised
    # at demo scale; production shapes should rely on the default tn_target=4096 sizing.
    out = logistic_regression_forward(item_embs, user_embs, weight_t, bias, tn=32)
    out = jax.block_until_ready(out)

    # Pure-JAX reference (same bf16 embedding values, f32 math).
    feats = jnp.concatenate(
        [item_embs, jnp.broadcast_to(user_embs[:, :, None, :], item_embs.shape)],
        axis=-1).astype(jnp.float32)
    ref = (feats @ weight_t + bias)[..., 0]

    assert out.shape == (B, S, I), out.shape
    assert jnp.allclose(out, ref, atol=1e-4, rtol=1e-4), float(jnp.max(jnp.abs(out - ref)))

    print("KERNEL_OK")
</pallas_src>

<mosaic_0001>
module attributes {stable_mosaic.version = 11 : i64} {
  func.func @logreg_kernel(%arg0: i32, %arg1: memref<32x512xbf16, #tpu.memory_space<vmem>>, %arg2: memref<32x32xbf16, #tpu.memory_space<vmem>>, %arg3: memref<512x16xf32, #tpu.memory_space<vmem>>, %arg4: memref<32x16xf32, #tpu.memory_space<vmem>>, %arg5: memref<1xf32, #tpu.memory_space<smem>>, %arg6: memref<32x16xf32, #tpu.memory_space<vmem>>) attributes {dimension_semantics = [#tpu.dimension_semantics<parallel>], iteration_bounds = array<i64: 4>, scalar_prefetch = 0 : i64, scratch_operands = 0 : i64, tpu.core_type = #tpu.core_type<tc>, window_params = [{transform_indices = @transform_0, window_bounds = array<i64: 32, 512>}, {transform_indices = @transform_1, window_bounds = array<i64: 32, 32>}, {pipeline_mode = #tpu.pipeline_mode<synchronous>, transform_indices = @transform_2, window_bounds = array<i64: 512, 16>}, {pipeline_mode = #tpu.pipeline_mode<synchronous>, transform_indices = @transform_3, window_bounds = array<i64: 32, 16>}, {transform_indices = @transform_4, window_bounds = array<i64: 1>}, {transform_indices = @transform_5, window_bounds = array<i64: 32, 16>}]} {
    %c0 = arith.constant 0 : index
    %c0_0 = arith.constant 0 : index
    %0 = vector.load %arg1[%c0, %c0_0] : memref<32x512xbf16, #tpu.memory_space<vmem>>, vector<32x512xbf16>
    %1 = arith.extf %0 : vector<32x512xbf16> to vector<32x512xf32>
    %c0_1 = arith.constant 0 : index
    %c0_2 = arith.constant 0 : index
    %2 = vector.load %arg3[%c0_1, %c0_2] : memref<512x16xf32, #tpu.memory_space<vmem>>, vector<512x16xf32>
    %cst = arith.constant dense<0.000000e+00> : vector<32x16xf32>
    %3 = tpu.matmul %1, %2, %cst {dimension_numbers = #tpu.dot_dimension_numbers<[1], [0], [0], [1], [0, 0, 1, 1], [], []>} : vector<32x512xf32>, vector<512x16xf32>, vector<32x16xf32> -> vector<32x16xf32>
    %c0_3 = arith.constant 0 : index
    %c0_4 = arith.constant 0 : index
    %4 = vector.load %arg2[%c0_3, %c0_4] : memref<32x32xbf16, #tpu.memory_space<vmem>>, vector<32x32xbf16>
    %5 = arith.extf %4 : vector<32x32xbf16> to vector<32x32xf32>
    %c0_5 = arith.constant 0 : index
    %c0_6 = arith.constant 0 : index
    %6 = vector.load %arg4[%c0_5, %c0_6] : memref<32x16xf32, #tpu.memory_space<vmem>>, vector<32x16xf32>
    %cst_7 = arith.constant dense<0.000000e+00> : vector<32x16xf32>
    %7 = tpu.matmul %5, %6, %cst_7 {dimension_numbers = #tpu.dot_dimension_numbers<[1], [0], [0], [1], [0, 0, 1, 1], [], []>} : vector<32x32xf32>, vector<32x16xf32>, vector<32x16xf32> -> vector<32x16xf32>
    %8 = arith.addf %3, %7 : vector<32x16xf32>
    %c0_8 = arith.constant 0 : index
    %9 = memref.load %arg5[%c0_8] : memref<1xf32, #tpu.memory_space<smem>>
    %10 = vector.broadcast %9 : f32 to vector<32x16xf32>
    %11 = arith.addf %8, %10 : vector<32x16xf32>
    %c0_9 = arith.constant 0 : index
    %c0_10 = arith.constant 0 : index
    %12 = vector.load %arg6[%c0_9, %c0_10] : memref<32x16xf32, #tpu.memory_space<vmem>>, vector<32x16xf32>
    tpu.vector_store %arg6[%c0_9, %c0_10], %11 {strides = array<i32>} : memref<32x16xf32, #tpu.memory_space<vmem>>, vector<32x16xf32>,
    return
  }
  func.func @transform_0(%arg0: i32) -> (i32, i32) {
    %c0_i32 = arith.constant 0 : i32
    %c0_i32_0 = arith.constant 0 : i32
    return %arg0, %c0_i32 : i32, i32
  }
  func.func @transform_1(%arg0: i32) -> (i32, i32) {
    %c0_i32 = arith.constant 0 : i32
    %c0_i32_0 = arith.constant 0 : i32
    return %arg0, %c0_i32 : i32, i32
  }
  func.func @transform_2(%arg0: i32) -> (i32, i32) {
    %c0_i32 = arith.constant 0 : i32
    %c0_i32_0 = arith.constant 0 : i32
    %c0_i32_1 = arith.constant 0 : i32
    return %c0_i32, %c0_i32_0 : i32, i32
  }
  func.func @transform_3(%arg0: i32) -> (i32, i32) {
    %c0_i32 = arith.constant 0 : i32
    %c0_i32_0 = arith.constant 0 : i32
    %c0_i32_1 = arith.constant 0 : i32
    return %c0_i32, %c0_i32_0 : i32, i32
  }
  func.func @transform_4(%arg0: i32) -> i32 {
    %c0_i32 = arith.constant 0 : i32
    %c0_i32_0 = arith.constant 0 : i32
    return %c0_i32 : i32
  }
  func.func @transform_5(%arg0: i32) -> (i32, i32) {
    %c0_i32 = arith.constant 0 : i32
    %c0_i32_0 = arith.constant 0 : i32
    return %arg0, %c0_i32 : i32, i32
  }
}

</mosaic_0001>

<bundles_post_ra>
// kernel: tpu_custom_call.1
= control target key start
LH: loop header
LB: loop body
LE: loop exit
PB: predicated region body
PF: predicated region fallthrough
CT: control target
= control target key end

     0   :  { %s888_s20 = smov 0   ;;  %s1139_s0 = inlined_call_operand.vmem [shape: bf16[128,512], index: 0, kind: input, shape index: {}]   ;;  %s1140_s1 = inlined_call_operand.vmem [shape: bf16[128,32], index: 1, kind: input, shape index: {}]   ;;  %s1141_s2 = inlined_call_operand.vmem [shape: f32[512,16], index: 2, kind: input, shape index: {}]   ;;  %s1142_s3 = inlined_call_operand.vmem [shape: f32[32,16], index: 3, kind: input, shape index: {}]   ;;  %s1143_s4 = inlined_call_operand.<no memory space> [shape: f32[1], index: 4, kind: input, shape index: {}]   ;;  %s1144_s5 = inlined_call_operand.vmem [shape: f32[128,16], index: 5, kind: output, shape index: {}]  }
   0x1   :  { %10 = sst [smem:[#allocation2]] %s1143_s4 }
   0x2 LB: > { %s701_s21 = sadd.s32 4294967295, %s853_s20   ;;  %p705_p0 = scmp.ge.s32.totalorder %s853_s20, 1  ;;  %s853_s20 = sphi %s888_s20, %s16_s20  }
   0x3   : > { %p201_p1 = scmp.lt.s32.totalorder %s853_s20, 5 }
   0x5   : > { %p202_p2 = pnand %p705_p0, %p201_p1 }
   0x6   : > { %s706_s27 = sshll.u32 (!%p202_p2), %s701_s21, 2  ;;  %s622_s28 = sld [smem:[#allocation2]] (!%p202_p2) }
   0x7   : > { %205 = sbr.rel (%p202_p2) target bundleno = 270 (0x10e), region = 40  ;;  %p236_p3 = scmp.lt.s32.totalorder (!%p202_p2), %s706_s27, 15 }
   0xc   : > { %v309_v0 = vld [vmem:[%s1141_s2 + $0xf8] sm:$0xff]  ;;  %v308_v3 = vld [vmem:[%s1141_s2 + $0xf0] sm:$0xff]  ;;  %v307_v6 = vld [vmem:[%s1141_s2 + $0xe8] sm:$0xff]  ;;  %s1146_s27 = smov (!%p236_p3, %s706_s27), 15  ;;  %vm354_vm0 = vcmask 261120   ;;  %vm628_vm1 = vcmask 130048  }
   0xd   : > { %v353_v1 = vld [vmem:[%s1142_s3 + $0x18] sm:$0xff]  ;;  %737 = vmatprep.subr.mxu1 %v309_v0  ;;  %v352_v4 = vld [vmem:[%s1142_s3 + $0x10] sm:$0xff]  ;;  %v351_v7 = vld [vmem:[%s1142_s3 + $0x8] sm:$0xff]  ;;  %s710_s22 = sshll.u32 %s1146_s27, 2  ;;  %s719_s7 = sshll.u32 %s1146_s27, 4 }
   0xe   : > { %v293_v2 = vld [vmem:[%s1141_s2 + $0x78] sm:$0xff]  ;;  %825 = vmatprep.subr.mxu0 %v353_v1  ;;  %v292_v5 = vld [vmem:[%s1141_s2 + $0x70] sm:$0xff]  ;;  %v291_v8 = vld [vmem:[%s1141_s2 + $0x68] sm:$0xff]  ;;  %s941_s26 = scalar_lea.vmem %s1140_s1, %s710_s22  ;;  %s1043_s23 = scalar_lea.vmem %s1139_s0, %s719_s7 }
   0xf   : > { %738 = vmatpush3.msra.mxu1 %v293_v2  ;;  %826 = vmatpush3.msra.mxu0 %v353_v1  ;;  %v306_v9 = vld [vmem:[%s1141_s2 + $0xe0] sm:$0xff]  ;;  %v305_v12 = vld [vmem:[%s1141_s2 + $0xd8] sm:$0xff]  ;;  %v304_v18 = vld [vmem:[%s1141_s2 + $0xd0] sm:$0xff] }
  0x10   : > { %739 = vmatprep.subr.mxu1 %v308_v3  ;;  %827 = vmatprep.subr.mxu0 %v352_v4  ;;  %v350_v10 = vld [vmem:[%s1142_s3] sm:$0xff]  ;;  %v341_v13 = vld [vmem:[%s1141_s2 + $0x1f8] sm:$0xff]  ;;  %v288_v20 = vld [vmem:[%s1141_s2 + $0x50] sm:$0xff] }
  0x11   : > { %740 = vmatpush3.msra.mxu1 %v292_v5  ;;  %828 = vmatpush3.msra.mxu0 %v352_v4  ;;  %v290_v11 = vld [vmem:[%s1141_s2 + $0x60] sm:$0xff]  ;;  %v289_v15 = vld [vmem:[%s1141_s2 + $0x58] sm:$0xff]  ;;  %v340_v21 = vld [vmem:[%s1141_s2 + $0x1f0] sm:$0xff] }
  0x12   : > { %741 = vmatprep.subr.mxu1 %v307_v6  ;;  %829 = vmatprep.subr.mxu0 %v351_v7  ;;  %v721_v14 = vld [vmem:[%s941_s26] sm:$0xff]   ;;  %v325_v19 = vld [vmem:[%s1141_s2 + $0x178] sm:$0xff]  ;;  %v303_v22 = vld [vmem:[%s1141_s2 + $0xc8] sm:$0xff] }
  0x13   : > { %742 = vmatpush3.msra.mxu1 %v291_v8  ;;  %830 = vmatpush3.msra.mxu0 %v351_v7  ;;  %v722_v16 = vunpack.c.l.bf16 %v721_v14  ;;  %v723_v17 = vunpack.c.h.bf16 %v721_v14  ;;  %v324_v23 = vld [vmem:[%s1141_s2 + $0x170] sm:$0xff]  ;;  %v287_v24 = vld [vmem:[%s1141_s2 + $0x48] sm:$0xff]  ;;  %v302_v26 = vld [vmem:[%s1141_s2 + $0xc0] sm:$0xff] }
  0x14   : > { %743 = vmatprep.subr.mxu1 %v306_v9  ;;  %831 = vmatprep.subr.mxu0 %v350_v10  ;;  %v339_v25 = vld [vmem:[%s1141_s2 + $0x1e8] sm:$0xff]  ;;  %v286_v28 = vld [vmem:[%s1141_s2 + $0x40] sm:$0xff]  ;;  %v301_v30 = vld [vmem:[%s1141_s2 + $0xb8] sm:$0xff] }
  0x15   : > { %744 = vmatpush3.msra.mxu1 %v290_v11  ;;  %832 = vmatpush3.msra.mxu0 %v350_v10  ;;  %v323_v27 = vld [vmem:[%s1141_s2 + $0x168] sm:$0xff]  ;;  %v338_v29 = vld [vmem:[%s1141_s2 + $0x1e0] sm:$0xff]  ;;  %v285_v32 = vld [vmem:[%s1141_s2 + $0x38] sm:$0xff] }
  0x16   : > { %745 = vmatprep.subr.mxu1 %v305_v12  ;;  %781 = vmatprep.subr.mxu0 %v341_v13  ;;  %v322_v31 = vld [vmem:[%s1141_s2 + $0x160] sm:$0xff]  ;;  %v337_v33 = vld [vmem:[%s1141_s2 + $0x1d8] sm:$0xff]  ;;  %v300_v34 = vld [vmem:[%s1141_s2 + $0xb0] sm:$0xff] }
  0x17   : > { %833 = vmatprep.mubr.msk.f32.mxu0 %vm354_vm0, %v722_v16  ;;  %746 = vmatpush3.msra.mxu1 %v289_v15  ;;  %v321_v35 = vld [vmem:[%s1141_s2 + $0x158] sm:$0xff]  ;;  %v284_v36 = vld [vmem:[%s1141_s2 + $0x30] sm:$0xff]  ;;  %v299_v38 = vld [vmem:[%s1141_s2 + $0xa8] sm:$0xff] }
  0x18   : > { %834 = vmatmul.mubr.msk.f32.vlgmr.msra.gmra.mxu0 %vm354_vm0, %v723_v17  ;;  %747 = vmatprep.subr.mxu1 %v304_v18  ;;  %v336_v37 = vld [vmem:[%s1141_s2 + $0x1d0] sm:$0xff]  ;;  %v283_v40 = vld [vmem:[%s1141_s2 + $0x28] sm:$0xff]  ;;  %v298_v42 = vld [vmem:[%s1141_s2 + $0xa0] sm:$0xff] }
  0x19   : > { %782 = vmatpush3.msra.mxu0 %v325_v19  ;;  %748 = vmatpush3.msra.mxu1 %v288_v20  ;;  %v320_v39 = vld [vmem:[%s1141_s2 + $0x150] sm:$0xff]  ;;  %v335_v41 = vld [vmem:[%s1141_s2 + $0x1c8] sm:$0xff]  ;;  %v282_v44 = vld [vmem:[%s1141_s2 + $0x20] sm:$0xff] }
  0x1a   : > { %783 = vmatprep.subr.mxu0 %v340_v21  ;;  %749 = vmatprep.subr.mxu1 %v303_v22  ;;  %v319_v43 = vld [vmem:[%s1141_s2 + $0x148] sm:$0xff]  ;;  %v334_v45 = vld [vmem:[%s1141_s2 + $0x1c0] sm:$0xff]  ;;  %v297_v46 = vld [vmem:[%s1141_s2 + $0x98] sm:$0xff] }
  0x1b   : > { %784 = vmatpush3.msra.mxu0 %v324_v23  ;;  %750 = vmatpush3.msra.mxu1 %v287_v24  ;;  %v318_v47 = vld [vmem:[%s1141_s2 + $0x140] sm:$0xff]  ;;  %v281_v48 = vld [vmem:[%s1141_s2 + $0x18] sm:$0xff]  ;;  %v296_v50 = vld [vmem:[%s1141_s2 + $0x90] sm:$0xff] }
  0x1c   : > { %785 = vmatprep.subr.mxu0 %v339_v25  ;;  %751 = vmatprep.subr.mxu1 %v302_v26  ;;  %v333_v49 = vld [vmem:[%s1141_s2 + $0x1b8] sm:$0xff]  ;;  %v280_v52 = vld [vmem:[%s1141_s2 + $0x10] sm:$0xff]  ;;  %v295_v54 = vld [vmem:[%s1141_s2 + $0x88] sm:$0xff] }
  0x1d   : > { %786 = vmatpush3.msra.mxu0 %v323_v27  ;;  %752 = vmatpush3.msra.mxu1 %v286_v28  ;;  %v317_v51 = vld [vmem:[%s1141_s2 + $0x138] sm:$0xff]  ;;  %v332_v53 = vld [vmem:[%s1141_s2 + $0x1b0] sm:$0xff]  ;;  %v254_v55 = vld [vmem:[%s1043_s23] sm:$0xff] }
  0x1e   : > { %787 = vmatprep.subr.mxu0 %v338_v29  ;;  %753 = vmatprep.subr.mxu1 %v301_v30  ;;  %v316_v56 = vld [vmem:[%s1141_s2 + $0x130] sm:$0xff]  ;;  %v279_v57 = vld [vmem:[%s1141_s2 + $0x8] sm:$0xff]  ;;  %v294_v60 = vld [vmem:[%s1141_s2 + $0x80] sm:$0xff]  ;;  %v263_v63 = vunpack.c.h.bf16 %v254_v55  ;;  %v262_v1 = vunpack.c.l.bf16 %v254_v55 }
  0x1f   : > { %788 = vmatpush3.msra.mxu0 %v322_v31  ;;  %754 = vmatpush3.msra.mxu1 %v285_v32  ;;  %v728_v58 = vld [vmem:[%s941_s26 + $0x8] sm:$0xff]   ;;  %v278_v62 = vld [vmem:[%s1141_s2] sm:$0xff]  ;;  %v256_v0 = vld [vmem:[%s1043_s23 + $0x10] sm:$0xff] }
  0x20   : > { %789 = vmatprep.subr.mxu0 %v337_v33  ;;  %755 = vmatprep.subr.mxu1 %v300_v34  ;;  %v331_v59 = vld [vmem:[%s1141_s2 + $0x1a8] sm:$0xff]  ;;  %v330_v2 = vld [vmem:[%s1141_s2 + $0x1a0] sm:$0xff]  ;;  %v726_v3 = vunpack.c.l.bf16 %v728_v58  ;;  %v329_v5 = vld [vmem:[%s1141_s2 + $0x198] sm:$0xff]  ;;  %v267_v6 = vunpack.c.h.bf16 %v256_v0  ;;  %v727_v8 = vunpack.c.h.bf16 %v728_v58  ;;  %v266_v12 = vunpack.c.l.bf16 %v256_v0 }
  0x21   : > { %790 = vmatpush3.msra.mxu0 %v321_v35  ;;  %756 = vmatpush3.msra.mxu1 %v284_v36  ;;  %v315_v61 = vld [vmem:[%s1141_s2 + $0x128] sm:$0xff]  ;;  %v314_v4 = vld [vmem:[%s1141_s2 + $0x120] sm:$0xff]  ;;  %v313_v9 = vld [vmem:[%s1141_s2 + $0x118] sm:$0xff] }
  0x22   : > { %791 = vmatprep.subr.mxu0 %v336_v37  ;;  %757 = vmatprep.subr.mxu1 %v299_v38  ;;  %v258_v7 = vld [vmem:[%s1043_s23 + $0x20] sm:$0xff]  ;;  %v255_v10 = vld [vmem:[%s1043_s23 + $0x8] sm:$0xff]  ;;  %v328_v11 = vld [vmem:[%s1141_s2 + $0x190] sm:$0xff] }
  0x23   : > { %792 = vmatpush3.msra.mxu0 %v320_v39  ;;  %758 = vmatpush3.msra.mxu1 %v283_v40  ;;  %v312_v13 = vld [vmem:[%s1141_s2 + $0x110] sm:$0xff]  ;;  %v271_v14 = vunpack.c.h.bf16 %v258_v7  ;;  %v327_v15 = vld [vmem:[%s1141_s2 + $0x188] sm:$0xff]  ;;  %v265_v16 = vunpack.c.h.bf16 %v255_v10  ;;  %v257_v19 = vld [vmem:[%s1043_s23 + $0x18] sm:$0xff]  ;;  %v270_v21 = vunpack.c.l.bf16 %v258_v7  ;;  %v264_v23 = vunpack.c.l.bf16 %v255_v10 }
  0x24   : > { %793 = vmatprep.subr.mxu0 %v335_v41  ;;  %759 = vmatprep.subr.mxu1 %v298_v42  ;;  %v260_v17 = vld [vmem:[%s1043_s23 + $0x30] sm:$0xff]  ;;  %v311_v18 = vld [vmem:[%s1141_s2 + $0x108] sm:$0xff]  ;;  %v326_v20 = vld [vmem:[%s1141_s2 + $0x180] sm:$0xff]  ;;  %v269_v25 = vunpack.c.h.bf16 %v257_v19  ;;  %v268_v28 = vunpack.c.l.bf16 %v257_v19 }
  0x25   : > { %794 = vmatpush3.msra.mxu0 %v319_v43  ;;  %760 = vmatpush3.msra.mxu1 %v282_v44  ;;  %v310_v22 = vld [vmem:[%s1141_s2 + $0x100] sm:$0xff]  ;;  %v275_v24 = vunpack.c.h.bf16 %v260_v17  ;;  %v259_v26 = vld [vmem:[%s1043_s23 + $0x28] sm:$0xff]  ;;  %v274_v27 = vunpack.c.l.bf16 %v260_v17  ;;  %v261_v30 = vld [vmem:[%s1043_s23 + $0x38] sm:$0xff]  ;;  %s712_s23 = sshll.u32 %s1146_s27, 3 }
  0x26   : > { %795 = vmatprep.subr.mxu0 %v334_v45  ;;  %761 = vmatprep.subr.mxu1 %v297_v46  ;;  %v273_v29 = vunpack.c.h.bf16 %v259_v26  ;;  %v272_v31 = vunpack.c.l.bf16 %v259_v26  ;;  %v277_v32 = vunpack.c.h.bf16 %v261_v30  ;;  %v276_v33 = vunpack.c.l.bf16 %v261_v30  ;;  %s252_s26 = scalar_lea.vmem %s1144_s5, %s712_s23 }
  0x27   : > { %796 = vmatpush3.msra.mxu0 %v318_v47  ;;  %762 = vmatpush3.msra.mxu1 %v281_v48 }
  0x28   : > { %797 = vmatprep.subr.mxu0 %v333_v49  ;;  %763 = vmatprep.subr.mxu1 %v296_v50  ;;  %v623_v50 = vstv %s622_s28 }
  0x29   : > { %798 = vmatpush3.msra.mxu0 %v317_v51  ;;  %764 = vmatpush3.msra.mxu1 %v280_v52 }
  0x2a   : > { %799 = vmatprep.subr.mxu0 %v332_v53  ;;  %765 = vmatprep.subr.mxu1 %v295_v54 }
  0x2b   : > { %800 = vmatpush3.msra.mxu0 %v316_v56  ;;  %766 = vmatpush3.msra.mxu1 %v279_v57 }
  0x2c   : > { %801 = vmatprep.subr.mxu0 %v331_v59  ;;  %767 = vmatprep.subr.mxu1 %v294_v60 }
  0x2d   : > { %802 = vmatpush3.msra.mxu0 %v315_v61  ;;  %768 = vmatpush3.msra.mxu1 %v278_v62 }
  0x2e   : > { %516 = vmatprep.mubr.f32.mxu1 %v263_v63  ;;  %803 = vmatprep.subr.mxu0 %v330_v2 }
  0x2f   : > { %517 = vmatmul.mubr.f32.vlgmr.msra.gmra.mxu1 %v262_v1  ;;  %804 = vmatpush3.msra.mxu0 %v314_v4 }
  0x30   : > { %805 = vmatprep.subr.mxu0 %v329_v5  ;;  %836 = vmatprep.mubr.msk.f32.mxu0 %vm354_vm0, %v726_v3 }
  0x31   : > { %806 = vmatpush3.msra.mxu0 %v313_v9  ;;  %521 = vmatprep.mubr.f32.mxu1 %v267_v6 }
  0x32   : > { %837 = vmatmul.mubr.msk.f32.gmra.mxu0 %vm354_vm0, %v727_v8  ;;  %807 = vmatprep.subr.mxu0 %v328_v11 }
  0x33   : > { %522 = vmatmul.mubr.f32.gmra.mxu1 %v266_v12  ;;  %808 = vmatpush3.msra.mxu0 %v312_v13 }
  0x34   : > { %809 = vmatprep.subr.mxu0 %v327_v15  ;;  %526 = vmatprep.mubr.f32.mxu1 %v271_v14 }
  0x35   : > { %810 = vmatpush3.msra.mxu0 %v311_v18  ;;  %601 = vmatprep.mubr.f32.mxu0 %v265_v16 }
  0x36   : > { %811 = vmatprep.subr.mxu0 %v326_v20 }
  0x37   : > { %527 = vmatmul.mubr.f32.gmra.mxu1 %v270_v21  ;;  %812 = vmatpush3.msra.mxu0 %v310_v22 }
  0x38   : > { %602 = vmatmul.mubr.f32.vlgmr.msra.gmra.mxu0 %v264_v23  ;;  %531 = vmatprep.mubr.f32.mxu1 %v275_v24 }
  0x39   : > { %606 = vmatprep.mubr.f32.mxu0 %v269_v25 }
  0x3b   : > { %532 = vmatmul.mubr.f32.gmra.mxu1 %v274_v27 }
  0x3c   : > { %607 = vmatmul.mubr.f32.gmra.mxu0 %v268_v28 }
  0x3d   : > { %611 = vmatprep.mubr.f32.mxu0 %v273_v29 }
  0x40   : > { %612 = vmatmul.mubr.f32.gmra.mxu0 %v272_v31 }
  0x41   : > { %616 = vmatprep.mubr.f32.mxu0 %v277_v32 }
  0x44   : > { %617 = vmatmul.mubr.f32.gmra.mxu0 %v276_v33 }
  0xd8   : > { %v835_v34 = vpop.f32.mrf.mxu0 }
  0xda   : > { %v433_v36 = vpop.f32.mrf.mxu0 }
  0xef   : > { %v769_v35 = vpop.f32.mrf.mxu1 }
  0xf1   : > { %v770_v37 = vpop.f32.mrf.mxu1 }
  0xf2   : > { %v838_v38 = vpop.f32.mrf.mxu0  ;;  %v771_v42 = vadd.f32 %v770_v37, %v769_v35 }
  0xf3   : > { %v772_v39 = vpop.f32.mrf.mxu1 }
  0xf4   : > { %v443_v41 = vpop.f32.mrf.mxu0  ;;  %v519_v47 = vadd.f32 %v771_v42, %v433_v36 }
  0xf5   : > { %v773_v40 = vpop.f32.mrf.mxu1 }
  0xf6   : > { %v774_v48 = vadd.f32 %v773_v40, %v772_v39 }
  0xf7   : > { %v775_v43 = vpop.f32.mrf.mxu1 }
  0xf8   : > { %v813_v44 = vpop.f32.mrf.mxu0  ;;  %v524_v55 = vadd.f32 %v835_v34, %v774_v48 }
  0xf9   : > { %v776_v45 = vpop.f32.mrf.mxu1 }
  0xfa   : > { %v814_v46 = vpop.f32.mrf.mxu0  ;;  %v777_v56 = vadd.f32 %v776_v45, %v775_v43 }
  0xfb   : > { %v815_v49 = vadd.f32 %v814_v46, %v813_v44  ;;  %v778_v51 = vpop.f32.mrf.mxu1 }
  0xfc   : > { %v816_v52 = vpop.f32.mrf.mxu0  ;;  %v529_v63 = vadd.f32 %v777_v56, %v443_v41 }
  0xfd   : > { %v604_v53 = vadd.f32 %v815_v49, %v519_v47  ;;  %v779_v59 = vpop.f32.mrf.mxu1 }
  0xfe   : > { %v817_v54 = vpop.f32.mrf.mxu0  ;;  %v780_v0 = vadd.f32 %v779_v59, %v778_v51 }
  0xff   : > { %v624_v57 = vadd.f32 %v623_v50, %v604_v53  ;;  %v818_v58 = vadd.f32 %v817_v54, %v816_v52 }
 0x100   : > { %v819_v60 = vpop.f32.mrf.mxu0  ;;  %v534_v6 = vadd.f32 %v838_v38, %v780_v0 }
 0x101   : > { %629 = vst.msk [vmem:[%s252_s26] sm:$0xff] %vm628_vm1, %v624_v57  ;;  %v609_v61 = vadd.f32 %v818_v58, %v524_v55 }
 0x102   : > { %v820_v62 = vpop.f32.mrf.mxu0 }
 0x103   : > { %v625_v1 = vadd.f32 %v623_v50, %v609_v61  ;;  %v821_v2 = vadd.f32 %v820_v62, %v819_v60 }
 0x104   : > { %v822_v3 = vpop.f32.mrf.mxu0 }
 0x105   : > { %630 = vst.msk [vmem:[%s252_s26 + $0x8] sm:$0xff] %vm628_vm1, %v625_v1  ;;  %v614_v4 = vadd.f32 %v821_v2, %v529_v63 }
 0x106   : > { %v823_v5 = vpop.f32.mrf.mxu0 }
 0x107   : > { %v626_v7 = vadd.f32 %v623_v50, %v614_v4  ;;  %v824_v8 = vadd.f32 %v823_v5, %v822_v3 }
 0x109   : > { %631 = vst.msk [vmem:[%s252_s26 + $0x10] sm:$0xff] %vm628_vm1, %v626_v7  ;;  %v619_v9 = vadd.f32 %v824_v8, %v534_v6 }
 0x10b   : > { %v627_v10 = vadd.f32 %v623_v50, %v619_v9 }
 0x10d   : > { %632 = vst.msk [vmem:[%s252_s26 + $0x18] sm:$0xff] %vm628_vm1, %v627_v10 }
 0x10e PF: > { %s16_s20 = sadd.s32 1, %s853_s20  }
 0x10f   : > { %p13_p4 = scmp.ge.s32.totalorder %s16_s20, 6  }
 0x111   :  { %15 = sbr.rel (!%p13_p4) target bundleno = 2 (0x2), region = 73 }

</bundles_post_ra>
